<compile_context>
chip_gen: v6e
topology: v6e:2x2x1
jax: 0.10.0
libtpu: 0.0.40
codegen_flags: <defaults>
</compile_context>

<pallas_src>
import functools

import jax
import jax.numpy as jnp
from jax.experimental import pallas as pl
from jax.experimental.pallas import tpu as pltpu


def _round_up(a, b):
    return pl.cdiv(a, b) * b


def ffn_kernel(x_ref, w1_ref, b1_ref, w2_ref, b2_ref, o_ref, acc_ref):
    k = pl.program_id(1)

    @pl.when(k == 0)
    def _():
        acc_ref[...] = jnp.zeros_like(acc_ref)

    # (tm, d_model_pad) @ (d_model_pad, tk_ff) -> f32 (tm, tk_ff) on the MXU
    h = jnp.dot(x_ref[...], w1_ref[...], preferred_element_type=jnp.float32)
    h = jnp.maximum(h + b1_ref[...], 0.0)                      # bias + relu in f32 (VPU)
    # accumulate the d_ff chunk contribution: (tm, tk_ff) @ (tk_ff, d_model_pad)
    acc_ref[...] += jnp.dot(h.astype(w2_ref.dtype), w2_ref[...],
                            preferred_element_type=jnp.float32)

    @pl.when(k == pl.num_programs(1) - 1)
    def _():
        o_ref[...] = (acc_ref[...] + b2_ref[...]).astype(o_ref.dtype)


@functools.partial(jax.jit, static_argnames=("tm", "tk_ff", "compute_dtype"))
def positionwise_feed_forward(x, w1, b1, w2, b2, *, tm=256, tk_ff=512,
                              compute_dtype=None):
    """x: [batch, seq, d_model]; w1: [d_model, d_ff]; w2: [d_ff, d_model].

    Weights are stored pre-transposed w.r.t. nn.Linear so the kernel computes
    x @ w1 + b1 -> relu -> @ w2 + b2.
    """
    batch, seq, d_model = x.shape
    d_ff = w1.shape[1]
    n = batch * seq
    cdt = jnp.dtype(compute_dtype) if compute_dtype is not None else jnp.dtype(x.dtype)

    # Lane-dense / row-tile padding (zero padding is exact: padded x cols x zero W1
    # rows contribute 0, padded d_ff cols have b1=0 so relu(0)=0, padded W2 rows are 0,
    # padded output cols / rows are sliced off).
    d_model_pad = _round_up(d_model, 128)
    d_ff_pad = _round_up(d_ff, 128)
    tk = min(tk_ff, d_ff_pad)
    d_ff_pad = _round_up(d_ff_pad, tk)
    n_pad = _round_up(n, tm)

    x2d = jnp.pad(x.reshape(n, d_model).astype(cdt),
                  ((0, n_pad - n), (0, d_model_pad - d_model)))
    w1p = jnp.pad(w1.astype(cdt), ((0, d_model_pad - d_model), (0, d_ff_pad - d_ff)))
    w2p = jnp.pad(w2.astype(cdt), ((0, d_ff_pad - d_ff), (0, d_model_pad - d_model)))
    b1p = jnp.pad(b1.astype(jnp.float32), (0, d_ff_pad - d_ff)).reshape(1, d_ff_pad)
    b2p = jnp.pad(b2.astype(jnp.float32), (0, d_model_pad - d_model)).reshape(1, d_model_pad)

    cbytes = jnp.dtype(cdt).itemsize
    obytes = jnp.dtype(x.dtype).itemsize
    # double-buffered tiles + accumulator + live intermediate, with 2x headroom
    need = 2 * (tm * d_model_pad * cbytes + d_model_pad * tk * cbytes
                + tk * d_model_pad * cbytes + tk * 4 + d_model_pad * 4
                + tm * d_model_pad * obytes)
    need += tm * d_model_pad * 4 + tm * tk * 4
    vmem_limit = int(min(64 * 2**20, max(32 * 2**20, 2 * need)))

    flops = 4 * n_pad * d_model_pad * d_ff_pad  # two matmuls
    bytes_accessed = (x2d.size * cbytes + w1p.size * cbytes + w2p.size * cbytes
                      + b1p.size * 4 + b2p.size * 4 + n_pad * d_model_pad * obytes)

    out2d = pl.pallas_call(
        ffn_kernel,
        out_shape=jax.ShapeDtypeStruct((n_pad, d_model_pad), x.dtype),
        grid_spec=pltpu.PrefetchScalarGridSpec(
            num_scalar_prefetch=0,
            grid=(n_pad // tm, d_ff_pad // tk),
            in_specs=[
                pl.BlockSpec((tm, d_model_pad), lambda i, k: (i, 0)),   # x row tile
                pl.BlockSpec((d_model_pad, tk), lambda i, k: (0, k)),   # W1 d_ff chunk
                pl.BlockSpec((1, tk), lambda i, k: (0, k)),             # b1 chunk
                pl.BlockSpec((tk, d_model_pad), lambda i, k: (k, 0)),   # W2 d_ff chunk
                pl.BlockSpec((1, d_model_pad), lambda i, k: (0, 0)),    # b2
            ],
            out_specs=pl.BlockSpec((tm, d_model_pad), lambda i, k: (i, 0)),
            scratch_shapes=[pltpu.VMEM((tm, d_model_pad), jnp.float32)],
        ),
        compiler_params=pltpu.CompilerParams(
            dimension_semantics=("parallel", "arbitrary"),
            vmem_limit_bytes=vmem_limit,
        ),
        cost_estimate=pl.CostEstimate(flops=flops, transcendentals=0,
                                      bytes_accessed=bytes_accessed),
    )(x2d, w1p, b1p, w2p, b2p)

    return out2d[:n, :d_model].reshape(batch, seq, d_model)


if __name__ == "__main__":
    # small shapes consistent with the module
    batch, seq, d_model, d_ff = 2, 8, 32, 64

    key = jax.random.PRNGKey(0)
    kx, k1, kb1, k2, kb2 = jax.random.split(key, 5)

    x = jax.random.normal(kx, (batch, seq, d_model), dtype=jnp.float32)

    # deterministic nn.Linear-style init (uniform in +-1/sqrt(fan_in)),
    # stored pre-transposed for the kernel: y = x @ W^T + b  ->  x @ w1 here
    lim1 = 1.0 / (d_model ** 0.5)
    w1 = jax.random.uniform(k1, (d_model, d_ff), jnp.float32, -lim1, lim1)
    b1 = jax.random.uniform(kb1, (d_ff,), jnp.float32, -lim1, lim1)
    lim2 = 1.0 / (d_ff ** 0.5)
    w2 = jax.random.uniform(k2, (d_ff, d_model), jnp.float32, -lim2, lim2)
    b2 = jax.random.uniform(kb2, (d_model,), jnp.float32, -lim2, lim2)

    # pure-JAX reference (eval-mode dropout = identity)
    ref = (jnp.maximum(x.reshape(-1, d_model) @ w1 + b1, 0.0) @ w2 + b2)
    ref = ref.reshape(batch, seq, d_model)

    # f32 path (tight check)
    out = jax.block_until_ready(positionwise_feed_forward(x, w1, b1, w2, b2))
    assert out.shape == ref.shape
    assert jnp.allclose(out, ref, atol=1e-5, rtol=1e-5), "f32 mismatch vs reference"

    # bf16-operand / f32-accumulate path (MXU peak on v6e/v7x), loose check
    out_bf16 = jax.block_until_ready(
        positionwise_feed_forward(x, w1, b1, w2, b2, compute_dtype=jnp.bfloat16))
    assert jnp.allclose(out_bf16, ref, atol=5e-2, rtol=5e-2), "bf16 mismatch vs reference"

    print("KERNEL_OK")
</pallas_src>

<mosaic_0001>
module attributes {stable_mosaic.version = 11 : i64} {
  func.func @ffn_kernel(%arg0: i32, %arg1: i32, %arg2: memref<256x128xf32, #tpu.memory_space<vmem>>, %arg3: memref<128x128xf32, #tpu.memory_space<vmem>>, %arg4: memref<1x128xf32, #tpu.memory_space<vmem>>, %arg5: memref<128x128xf32, #tpu.memory_space<vmem>>, %arg6: memref<1x128xf32, #tpu.memory_space<vmem>>, %arg7: memref<256x128xf32, #tpu.memory_space<vmem>>, %arg8: memref<256x128xf32, #tpu.memory_space<vmem>>) attributes {dimension_semantics = [#tpu.dimension_semantics<parallel>, #tpu.dimension_semantics<arbitrary>], iteration_bounds = array<i64: 1, 1>, scalar_prefetch = 0 : i64, scratch_operands = 1 : i64, tpu.core_type = #tpu.core_type<tc>, window_params = [{transform_indices = @transform_0, window_bounds = array<i64: 256, 128>}, {transform_indices = @transform_1, window_bounds = array<i64: 128, 128>}, {transform_indices = @transform_2, window_bounds = array<i64: 1, 128>}, {transform_indices = @transform_3, window_bounds = array<i64: 128, 128>}, {pipeline_mode = #tpu.pipeline_mode<synchronous>, transform_indices = @transform_4, window_bounds = array<i64: 1, 128>}, {transform_indices = @transform_5, window_bounds = array<i64: 256, 128>}]} {
    %c0_i32 = arith.constant 0 : i32
    %0 = arith.cmpi eq, %arg1, %c0_i32 : i32
    %1 = arith.extui %0 : i1 to i32
    %c0_i32_0 = arith.constant 0 : i32
    %2 = arith.cmpi ne, %1, %c0_i32_0 : i32
    scf.if %2 {
      %cst_16 = arith.constant 0.000000e+00 : f32
      %19 = vector.broadcast %cst_16 : f32 to vector<256x128xf32>
      %c0_17 = arith.constant 0 : index
      %c0_18 = arith.constant 0 : index
      %20 = vector.load %arg8[%c0_17, %c0_18] : memref<256x128xf32, #tpu.memory_space<vmem>>, vector<256x128xf32>
      tpu.vector_store %arg8[%c0_17, %c0_18], %19 {strides = array<i32>} : memref<256x128xf32, #tpu.memory_space<vmem>>, vector<256x128xf32>,
    } else {
    }
    %c0 = arith.constant 0 : index
    %c0_1 = arith.constant 0 : index
    %3 = vector.load %arg2[%c0, %c0_1] : memref<256x128xf32, #tpu.memory_space<vmem>>, vector<256x128xf32>
    %c0_2 = arith.constant 0 : index
    %c0_3 = arith.constant 0 : index
    %4 = vector.load %arg3[%c0_2, %c0_3] : memref<128x128xf32, #tpu.memory_space<vmem>>, vector<128x128xf32>
    %cst = arith.constant dense<0.000000e+00> : vector<256x128xf32>
    %5 = tpu.matmul %3, %4, %cst {dimension_numbers = #tpu.dot_dimension_numbers<[1], [0], [0], [1], [0, 0, 1, 1], [], []>} : vector<256x128xf32>, vector<128x128xf32>, vector<256x128xf32> -> vector<256x128xf32>
    %c0_4 = arith.constant 0 : index
    %c0_5 = arith.constant 0 : index
    %6 = vector.load %arg4[%c0_4, %c0_5] : memref<1x128xf32, #tpu.memory_space<vmem>>, vector<1x128xf32>
    %7 = vector.broadcast %6 : vector<1x128xf32> to vector<256x128xf32>
    %8 = arith.addf %5, %7 : vector<256x128xf32>
    %cst_6 = arith.constant 0.000000e+00 : f32
    %9 = vector.broadcast %cst_6 : f32 to vector<256x128xf32>
    %10 = arith.maximumf %8, %9 : vector<256x128xf32>
    %c0_7 = arith.constant 0 : index
    %c0_8 = arith.constant 0 : index
    %11 = vector.load %arg8[%c0_7, %c0_8] : memref<256x128xf32, #tpu.memory_space<vmem>>, vector<256x128xf32>
    %c0_9 = arith.constant 0 : index
    %c0_10 = arith.constant 0 : index
    %12 = vector.load %arg5[%c0_9, %c0_10] : memref<128x128xf32, #tpu.memory_space<vmem>>, vector<128x128xf32>
    %cst_11 = arith.constant dense<0.000000e+00> : vector<256x128xf32>
    %13 = tpu.matmul %10, %12, %cst_11 {dimension_numbers = #tpu.dot_dimension_numbers<[1], [0], [0], [1], [0, 0, 1, 1], [], []>} : vector<256x128xf32>, vector<128x128xf32>, vector<256x128xf32> -> vector<256x128xf32>
    %14 = arith.addf %11, %13 : vector<256x128xf32>
    %c0_12 = arith.constant 0 : index
    %c0_13 = arith.constant 0 : index
    %15 = vector.load %arg8[%c0_12, %c0_13] : memref<256x128xf32, #tpu.memory_space<vmem>>, vector<256x128xf32>
    tpu.vector_store %arg8[%c0_12, %c0_13], %14 {strides = array<i32>} : memref<256x128xf32, #tpu.memory_space<vmem>>, vector<256x128xf32>,
    %c0_i32_14 = arith.constant 0 : i32
    %16 = arith.cmpi eq, %arg1, %c0_i32_14 : i32
    %17 = arith.extui %16 : i1 to i32
    %c0_i32_15 = arith.constant 0 : i32
    %18 = arith.cmpi ne, %17, %c0_i32_15 : i32
    scf.if %18 {
      %c0_16 = arith.constant 0 : index
      %c0_17 = arith.constant 0 : index
      %19 = vector.load %arg8[%c0_16, %c0_17] : memref<256x128xf32, #tpu.memory_space<vmem>>, vector<256x128xf32>
      %c0_18 = arith.constant 0 : index
      %c0_19 = arith.constant 0 : index
      %20 = vector.load %arg6[%c0_18, %c0_19] : memref<1x128xf32, #tpu.memory_space<vmem>>, vector<1x128xf32>
      %21 = vector.broadcast %20 : vector<1x128xf32> to vector<256x128xf32>
      %22 = arith.addf %19, %21 : vector<256x128xf32>
      %c0_20 = arith.constant 0 : index
      %c0_21 = arith.constant 0 : index
      %23 = vector.load %arg7[%c0_20, %c0_21] : memref<256x128xf32, #tpu.memory_space<vmem>>, vector<256x128xf32>
      tpu.vector_store %arg7[%c0_20, %c0_21], %22 {strides = array<i32>} : memref<256x128xf32, #tpu.memory_space<vmem>>, vector<256x128xf32>,
    } else {
    }
    return
  }
  func.func @transform_0(%arg0: i32, %arg1: i32) -> (i32, i32) {
    %c0_i32 = arith.constant 0 : i32
    %c0_i32_0 = arith.constant 0 : i32
    return %arg0, %c0_i32 : i32, i32
  }
  func.func @transform_1(%arg0: i32, %arg1: i32) -> (i32, i32) {
    %c0_i32 = arith.constant 0 : i32
    %c0_i32_0 = arith.constant 0 : i32
    return %c0_i32, %arg1 : i32, i32
  }
  func.func @transform_2(%arg0: i32, %arg1: i32) -> (i32, i32) {
    %c0_i32 = arith.constant 0 : i32
    %c0_i32_0 = arith.constant 0 : i32
    return %c0_i32, %arg1 : i32, i32
  }
  func.func @transform_3(%arg0: i32, %arg1: i32) -> (i32, i32) {
    %c0_i32 = arith.constant 0 : i32
    %c0_i32_0 = arith.constant 0 : i32
    return %arg1, %c0_i32 : i32, i32
  }
  func.func @transform_4(%arg0: i32, %arg1: i32) -> (i32, i32) {
    %c0_i32 = arith.constant 0 : i32
    %c0_i32_0 = arith.constant 0 : i32
    %c0_i32_1 = arith.constant 0 : i32
    return %c0_i32, %c0_i32_0 : i32, i32
  }
  func.func @transform_5(%arg0: i32, %arg1: i32) -> (i32, i32) {
    %c0_i32 = arith.constant 0 : i32
    %c0_i32_0 = arith.constant 0 : i32
    return %arg0, %c0_i32 : i32, i32
  }
}

</mosaic_0001>

<bundles_post_ra>
// kernel: positionwise_feed_forward.1
= control target key start
LH: loop header
LB: loop body
LE: loop exit
PB: predicated region body
PF: predicated region fallthrough
CT: control target
= control target key end

     0   :  { %s1465_s1 = inlined_call_operand.vmem [shape: f32[128,128], index: 1, kind: input, shape index: {}]   ;;  %s1466_s0 = inlined_call_operand.vmem [shape: f32[256,128], index: 0, kind: input, shape index: {}]   ;;  %s1467_s3 = inlined_call_operand.vmem [shape: f32[128,128], index: 3, kind: input, shape index: {}]   ;;  %s1468_s2 = inlined_call_operand.vmem [shape: f32[1,128], index: 2, kind: input, shape index: {}]   ;;  %s1469_s4 = inlined_call_operand.vmem [shape: f32[1,128], index: 4, kind: input, shape index: {}]   ;;  %s1470_s5 = inlined_call_operand.vmem [shape: f32[256,128], index: 5, kind: output, shape index: {}]  }
   0x1   :  { %v103_v0 = vld [vmem:[%s1465_s1 + $0x78] sm:$0xff]  ;;  %v102_v1 = vld [vmem:[%s1465_s1 + $0x70] sm:$0xff]  ;;  %v101_v2 = vld [vmem:[%s1465_s1 + $0x68] sm:$0xff] }
   0x2   :  { %913 = vmatprep.subr.mxu0 %v103_v0  ;;  %v100_v3 = vld [vmem:[%s1465_s1 + $0x60] sm:$0xff]  ;;  %v99_v5 = vld [vmem:[%s1465_s1 + $0x58] sm:$0xff]  ;;  %v98_v6 = vld [vmem:[%s1465_s1 + $0x50] sm:$0xff] }
   0x3   :  { %914 = vmatpush3.msra.mxu0 %v103_v0  ;;  %v56_v4 = vld [vmem:[%s1466_s0] sm:$0xff]  ;;  %v97_v7 = vld [vmem:[%s1465_s1 + $0x48] sm:$0xff]  ;;  %v95_v9 = vld [vmem:[%s1465_s1 + $0x38] sm:$0xff] }
   0x4   :  { %915 = vmatprep.subr.mxu0 %v102_v1  ;;  %945 = vmatprep.mubr.f32.mxu0 %v56_v4  ;;  %v96_v8 = vld [vmem:[%s1465_s1 + $0x40] sm:$0xff]  ;;  %v94_v10 = vld [vmem:[%s1465_s1 + $0x30] sm:$0xff]  ;;  %v415_v11 = vld [vmem:[%s1467_s3 + $0x78] sm:$0xff] }
   0x5   :  { %916 = vmatpush3.msra.mxu0 %v102_v1  ;;  %v414_v12 = vld [vmem:[%s1467_s3 + $0x70] sm:$0xff]  ;;  %993 = vmatprep.subr.mxu1 %v415_v11  ;;  %v93_v13 = vld [vmem:[%s1465_s1 + $0x28] sm:$0xff]  ;;  %v92_v15 = vld [vmem:[%s1465_s1 + $0x20] sm:$0xff] }
   0x6   :  { %917 = vmatprep.subr.mxu0 %v101_v2  ;;  %994 = vmatpush3.msra.mxu1 %v415_v11  ;;  %v413_v14 = vld [vmem:[%s1467_s3 + $0x68] sm:$0xff]  ;;  %v412_v16 = vld [vmem:[%s1467_s3 + $0x60] sm:$0xff]  ;;  %v91_v17 = vld [vmem:[%s1465_s1 + $0x18] sm:$0xff] }
   0x7   :  { %918 = vmatpush3.msra.mxu0 %v101_v2  ;;  %995 = vmatprep.subr.mxu1 %v414_v12  ;;  %v411_v18 = vld [vmem:[%s1467_s3 + $0x58] sm:$0xff]  ;;  %v90_v19 = vld [vmem:[%s1465_s1 + $0x10] sm:$0xff]  ;;  %v89_v21 = vld [vmem:[%s1465_s1 + $0x8] sm:$0xff] }
   0x8   :  { %919 = vmatprep.subr.mxu0 %v100_v3  ;;  %996 = vmatpush3.msra.mxu1 %v414_v12  ;;  %v410_v20 = vld [vmem:[%s1467_s3 + $0x50] sm:$0xff]  ;;  %v409_v22 = vld [vmem:[%s1467_s3 + $0x48] sm:$0xff]  ;;  %v88_v23 = vld [vmem:[%s1465_s1] sm:$0xff] }
   0x9   :  { %920 = vmatpush3.msra.mxu0 %v100_v3  ;;  %997 = vmatprep.subr.mxu1 %v413_v14  ;;  %v408_v24 = vld [vmem:[%s1467_s3 + $0x40] sm:$0xff]  ;;  %v57_v25 = vld [vmem:[%s1466_s0 + $0x8] sm:$0xff]  ;;  %v407_v26 = vld [vmem:[%s1467_s3 + $0x38] sm:$0xff] }
   0xa   :  { %921 = vmatprep.subr.mxu0 %v99_v5  ;;  %998 = vmatpush3.msra.mxu1 %v413_v14  ;;  %v58_v27 = vld [vmem:[%s1466_s0 + $0x10] sm:$0xff]  ;;  %v59_v29 = vld [vmem:[%s1466_s0 + $0x18] sm:$0xff]  ;;  %v405_v30 = vld [vmem:[%s1467_s3 + $0x28] sm:$0xff] }
   0xb   :  { %922 = vmatpush3.msra.mxu0 %v99_v5  ;;  %999 = vmatprep.subr.mxu1 %v412_v16  ;;  %v406_v28 = vld [vmem:[%s1467_s3 + $0x30] sm:$0xff]  ;;  %v60_v31 = vld [vmem:[%s1466_s0 + $0x20] sm:$0xff]  ;;  %v61_v33 = vld [vmem:[%s1466_s0 + $0x28] sm:$0xff] }
   0xc   :  { %923 = vmatprep.subr.mxu0 %v98_v6  ;;  %1000 = vmatpush3.msra.mxu1 %v412_v16  ;;  %v404_v32 = vld [vmem:[%s1467_s3 + $0x20] sm:$0xff]  ;;  %v62_v34 = vld [vmem:[%s1466_s0 + $0x30] sm:$0xff]  ;;  %v63_v35 = vld [vmem:[%s1466_s0 + $0x38] sm:$0xff] }
   0xd   :  { %924 = vmatpush3.msra.mxu0 %v98_v6  ;;  %1001 = vmatprep.subr.mxu1 %v411_v18  ;;  %v64_v36 = vld [vmem:[%s1466_s0 + $0x40] sm:$0xff]  ;;  %v65_v37 = vld [vmem:[%s1466_s0 + $0x48] sm:$0xff]  ;;  %v66_v38 = vld [vmem:[%s1466_s0 + $0x50] sm:$0xff] }
   0xe   :  { %925 = vmatprep.subr.mxu0 %v97_v7  ;;  %1002 = vmatpush3.msra.mxu1 %v411_v18  ;;  %v67_v39 = vld [vmem:[%s1466_s0 + $0x58] sm:$0xff]  ;;  %v68_v40 = vld [vmem:[%s1466_s0 + $0x60] sm:$0xff]  ;;  %v69_v41 = vld [vmem:[%s1466_s0 + $0x68] sm:$0xff] }
   0xf   :  { %926 = vmatpush3.msra.mxu0 %v97_v7  ;;  %1003 = vmatprep.subr.mxu1 %v410_v20  ;;  %v70_v42 = vld [vmem:[%s1466_s0 + $0x70] sm:$0xff]  ;;  %v71_v43 = vld [vmem:[%s1466_s0 + $0x78] sm:$0xff]  ;;  %v72_v44 = vld [vmem:[%s1466_s0 + $0x80] sm:$0xff] }
  0x10   :  { %927 = vmatprep.subr.mxu0 %v96_v8  ;;  %1004 = vmatpush3.msra.mxu1 %v410_v20  ;;  %v73_v45 = vld [vmem:[%s1466_s0 + $0x88] sm:$0xff]  ;;  %v74_v46 = vld [vmem:[%s1466_s0 + $0x90] sm:$0xff]  ;;  %v75_v47 = vld [vmem:[%s1466_s0 + $0x98] sm:$0xff] }
  0x11   :  { %928 = vmatpush3.msra.mxu0 %v96_v8  ;;  %1005 = vmatprep.subr.mxu1 %v409_v22  ;;  %v76_v48 = vld [vmem:[%s1466_s0 + $0xa0] sm:$0xff]  ;;  %v77_v49 = vld [vmem:[%s1466_s0 + $0xa8] sm:$0xff]  ;;  %v78_v50 = vld [vmem:[%s1466_s0 + $0xb0] sm:$0xff] }
  0x12   :  { %929 = vmatprep.subr.mxu0 %v95_v9  ;;  %1006 = vmatpush3.msra.mxu1 %v409_v22  ;;  %v79_v51 = vld [vmem:[%s1466_s0 + $0xb8] sm:$0xff]  ;;  %v80_v52 = vld [vmem:[%s1466_s0 + $0xc0] sm:$0xff]  ;;  %v81_v53 = vld [vmem:[%s1466_s0 + $0xc8] sm:$0xff] }
  0x13   :  { %930 = vmatpush3.msra.mxu0 %v95_v9  ;;  %1007 = vmatprep.subr.mxu1 %v408_v24  ;;  %v82_v54 = vld [vmem:[%s1466_s0 + $0xd0] sm:$0xff]  ;;  %v83_v55 = vld [vmem:[%s1466_s0 + $0xd8] sm:$0xff]  ;;  %v84_v56 = vld [vmem:[%s1466_s0 + $0xe0] sm:$0xff] }
  0x14   :  { %931 = vmatprep.subr.mxu0 %v94_v10  ;;  %1008 = vmatpush3.msra.mxu1 %v408_v24  ;;  %v85_v57 = vld [vmem:[%s1466_s0 + $0xe8] sm:$0xff]  ;;  %v86_v58 = vld [vmem:[%s1466_s0 + $0xf0] sm:$0xff]  ;;  %v87_v59 = vld [vmem:[%s1466_s0 + $0xf8] sm:$0xff] }
  0x15   :  { %932 = vmatpush3.msra.mxu0 %v94_v10  ;;  %1009 = vmatprep.subr.mxu1 %v407_v26  ;;  %v403_v60 = vld [vmem:[%s1467_s3 + $0x18] sm:$0xff]  ;;  %v402_v61 = vld [vmem:[%s1467_s3 + $0x10] sm:$0xff]  ;;  %v401_v62 = vld [vmem:[%s1467_s3 + $0x8] sm:$0xff] }
  0x16   :  { %933 = vmatprep.subr.mxu0 %v93_v13  ;;  %1010 = vmatpush3.msra.mxu1 %v407_v26  ;;  %v400_v63 = vld [vmem:[%s1467_s3] sm:$0xff] }
  0x17   :  { %934 = vmatpush3.msra.mxu0 %v93_v13  ;;  %1011 = vmatprep.subr.mxu1 %v406_v28  ;;  %v1298_v0 = vld [vmem:[%s1468_s2] ss:$0 sm:$0xff] }
  0x18   :  { %935 = vmatprep.subr.mxu0 %v92_v15  ;;  %1012 = vmatpush3.msra.mxu1 %v406_v28 }
  0x19   :  { %936 = vmatpush3.msra.mxu0 %v92_v15  ;;  %1013 = vmatprep.subr.mxu1 %v405_v30 }
  0x1a   :  { %937 = vmatprep.subr.mxu0 %v91_v17  ;;  %1014 = vmatpush3.msra.mxu1 %v405_v30 }
  0x1b   :  { %938 = vmatpush3.msra.mxu0 %v91_v17  ;;  %1015 = vmatprep.subr.mxu1 %v404_v32 }
  0x1c   :  { %939 = vmatprep.subr.mxu0 %v90_v19  ;;  %1016 = vmatpush3.msra.mxu1 %v404_v32 }
  0x1d   :  { %940 = vmatpush3.msra.mxu0 %v90_v19  ;;  %1017 = vmatprep.subr.mxu1 %v403_v60 }
  0x1e   :  { %941 = vmatprep.subr.mxu0 %v89_v21  ;;  %1018 = vmatpush3.msra.mxu1 %v403_v60 }
  0x1f   :  { %942 = vmatpush3.msra.mxu0 %v89_v21  ;;  %1019 = vmatprep.subr.mxu1 %v402_v61 }
  0x20   :  { %943 = vmatprep.subr.mxu0 %v88_v23  ;;  %1020 = vmatpush3.msra.mxu1 %v402_v61 }
  0x21   :  { %944 = vmatpush3.msra.mxu0 %v88_v23  ;;  %1021 = vmatprep.subr.mxu1 %v401_v62 }
  0x22   :  { %946 = vmatmul.mubr.f32.vlgmr.msra.gmra.mxu0 %v57_v25  ;;  %1022 = vmatpush3.msra.mxu1 %v401_v62 }
  0x23   :  { %948 = vmatprep.mubr.f32.mxu0 %v58_v27  ;;  %1023 = vmatprep.subr.mxu1 %v400_v63 }
  0x24   :  { %1024 = vmatpush3.msra.mxu1 %v400_v63 }
  0x26   :  { %949 = vmatmul.mubr.f32.gmra.mxu0 %v59_v29 }
  0x27   :  { %951 = vmatprep.mubr.f32.mxu0 %v60_v31 }
  0x2a   :  { %952 = vmatmul.mubr.f32.gmra.mxu0 %v61_v33 }
  0x2b   :  { %954 = vmatprep.mubr.f32.mxu0 %v62_v34 }
  0x2e   :  { %955 = vmatmul.mubr.f32.gmra.mxu0 %v63_v35 }
  0x2f   :  { %957 = vmatprep.mubr.f32.mxu0 %v64_v36 }
  0x32   :  { %958 = vmatmul.mubr.f32.gmra.mxu0 %v65_v37 }
  0x33   :  { %960 = vmatprep.mubr.f32.mxu0 %v66_v38 }
  0x36   :  { %961 = vmatmul.mubr.f32.gmra.mxu0 %v67_v39 }
  0x37   :  { %963 = vmatprep.mubr.f32.mxu0 %v68_v40 }
  0x3a   :  { %964 = vmatmul.mubr.f32.gmra.mxu0 %v69_v41 }
  0x3b   :  { %966 = vmatprep.mubr.f32.mxu0 %v70_v42 }
  0x3e   :  { %967 = vmatmul.mubr.f32.gmra.mxu0 %v71_v43 }
  0x3f   :  { %969 = vmatprep.mubr.f32.mxu0 %v72_v44 }
  0x42   :  { %970 = vmatmul.mubr.f32.gmra.mxu0 %v73_v45 }
  0x43   :  { %972 = vmatprep.mubr.f32.mxu0 %v74_v46 }
  0x46   :  { %973 = vmatmul.mubr.f32.gmra.mxu0 %v75_v47 }
  0x47   :  { %975 = vmatprep.mubr.f32.mxu0 %v76_v48 }
  0x4a   :  { %976 = vmatmul.mubr.f32.gmra.mxu0 %v77_v49 }
  0x4b   :  { %978 = vmatprep.mubr.f32.mxu0 %v78_v50 }
  0x4e   :  { %979 = vmatmul.mubr.f32.gmra.mxu0 %v79_v51 }
  0x4f   :  { %981 = vmatprep.mubr.f32.mxu0 %v80_v52 }
  0x52   :  { %982 = vmatmul.mubr.f32.gmra.mxu0 %v81_v53 }
  0x53   :  { %984 = vmatprep.mubr.f32.mxu0 %v82_v54 }
  0x56   :  { %985 = vmatmul.mubr.f32.gmra.mxu0 %v83_v55 }
  0x57   :  { %987 = vmatprep.mubr.f32.mxu0 %v84_v56 }
  0x5a   :  { %988 = vmatmul.mubr.f32.gmra.mxu0 %v85_v57 }
  0x5b   :  { %990 = vmatprep.mubr.f32.mxu0 %v86_v58 }
  0x5e   :  { %991 = vmatmul.mubr.f32.gmra.mxu0 %v87_v59 }
  0xe2   :  { %v947_v1 = vpop.f32.mrf.mxu0 }
  0xe3   :  { %v183_v2 = vadd.f32 %v947_v1, %v1298_v0 }
  0xe4   :  { %v177_v3 = vpop.f32.mrf.mxu0 }
  0xe5   :  { %v178_v4 = vadd.f32 %v1298_v0, %v177_v3  ;;  %v337_v7 = vmax.f32 %v183_v2, 0.0 }
  0xe6   :  { %v950_v5 = vpop.f32.mrf.mxu0 }
  0xe7   :  { %v336_v6 = vmax.f32 %v178_v4, 0.0  ;;  %v193_v8 = vadd.f32 %v950_v5, %v1298_v0 }
  0xe8   :  { %v187_v9 = vpop.f32.mrf.mxu0 }
  0xe9   :  { %v188_v10 = vadd.f32 %v1298_v0, %v187_v9  ;;  %1025 = vmatprep.mubr.f32.mxu1 %v336_v6  ;;  %v339_v13 = vmax.f32 %v193_v8, 0.0 }
  0xea   :  { %v953_v11 = vpop.f32.mrf.mxu0  ;;  %1026 = vmatmul.mubr.f32.vlgmr.msra.gmra.mxu1 %v337_v7 }
  0xeb   :  { %v338_v12 = vmax.f32 %v188_v10, 0.0  ;;  %v203_v14 = vadd.f32 %v953_v11, %v1298_v0 }
  0xec   :  { %v197_v15 = vpop.f32.mrf.mxu0 }
  0xed   :  { %v198_v16 = vadd.f32 %v1298_v0, %v197_v15  ;;  %1028 = vmatprep.mubr.f32.mxu1 %v338_v12  ;;  %v341_v19 = vmax.f32 %v203_v14, 0.0 }
  0xee   :  { %v956_v17 = vpop.f32.mrf.mxu0  ;;  %1029 = vmatmul.mubr.f32.gmra.mxu1 %v339_v13 }
  0xef   :  { %v340_v18 = vmax.f32 %v198_v16, 0.0  ;;  %v213_v20 = vadd.f32 %v956_v17, %v1298_v0 }
  0xf0   :  { %v207_v21 = vpop.f32.mrf.mxu0 }
  0xf1   :  { %v208_v22 = vadd.f32 %v1298_v0, %v207_v21  ;;  %1031 = vmatprep.mubr.f32.mxu1 %v340_v18  ;;  %v343_v25 = vmax.f32 %v213_v20, 0.0 }
  0xf2   :  { %v959_v23 = vpop.f32.mrf.mxu0  ;;  %1032 = vmatmul.mubr.f32.gmra.mxu1 %v341_v19 }
  0xf3   :  { %v342_v24 = vmax.f32 %v208_v22, 0.0  ;;  %v223_v26 = vadd.f32 %v959_v23, %v1298_v0 }
  0xf4   :  { %v217_v27 = vpop.f32.mrf.mxu0 }
  0xf5   :  { %v218_v28 = vadd.f32 %v1298_v0, %v217_v27  ;;  %1034 = vmatprep.mubr.f32.mxu1 %v342_v24  ;;  %v345_v31 = vmax.f32 %v223_v26, 0.0 }
  0xf6   :  { %v962_v29 = vpop.f32.mrf.mxu0  ;;  %1035 = vmatmul.mubr.f32.gmra.mxu1 %v343_v25 }
  0xf7   :  { %v344_v30 = vmax.f32 %v218_v28, 0.0  ;;  %v233_v32 = vadd.f32 %v962_v29, %v1298_v0 }
  0xf8   :  { %v227_v33 = vpop.f32.mrf.mxu0 }
  0xf9   :  { %v228_v34 = vadd.f32 %v1298_v0, %v227_v33  ;;  %1037 = vmatprep.mubr.f32.mxu1 %v344_v30  ;;  %v347_v37 = vmax.f32 %v233_v32, 0.0 }
  0xfa   :  { %v965_v35 = vpop.f32.mrf.mxu0  ;;  %1038 = vmatmul.mubr.f32.gmra.mxu1 %v345_v31 }
  0xfb   :  { %v346_v36 = vmax.f32 %v228_v34, 0.0  ;;  %v243_v38 = vadd.f32 %v965_v35, %v1298_v0  ;;  %v1335_v34 = vld [vmem:[%s1469_s4] ss:$0 sm:$0xff] }
  0xfc   :  { %v237_v39 = vpop.f32.mrf.mxu0 }
  0xfd   :  { %v238_v40 = vadd.f32 %v1298_v0, %v237_v39  ;;  %1040 = vmatprep.mubr.f32.mxu1 %v346_v36  ;;  %v349_v43 = vmax.f32 %v243_v38, 0.0 }
  0xfe   :  { %v968_v41 = vpop.f32.mrf.mxu0  ;;  %1041 = vmatmul.mubr.f32.gmra.mxu1 %v347_v37 }
  0xff   :  { %v348_v42 = vmax.f32 %v238_v40, 0.0  ;;  %v253_v44 = vadd.f32 %v968_v41, %v1298_v0 }
 0x100   :  { %v247_v45 = vpop.f32.mrf.mxu0 }
 0x101   :  { %v248_v46 = vadd.f32 %v1298_v0, %v247_v45  ;;  %1043 = vmatprep.mubr.f32.mxu1 %v348_v42  ;;  %v351_v49 = vmax.f32 %v253_v44, 0.0 }
 0x102   :  { %v971_v47 = vpop.f32.mrf.mxu0  ;;  %1044 = vmatmul.mubr.f32.gmra.mxu1 %v349_v43 }
 0x103   :  { %v350_v48 = vmax.f32 %v248_v46, 0.0  ;;  %v263_v50 = vadd.f32 %v971_v47, %v1298_v0 }
 0x104   :  { %v257_v51 = vpop.f32.mrf.mxu0 }
 0x105   :  { %v258_v52 = vadd.f32 %v1298_v0, %v257_v51  ;;  %1046 = vmatprep.mubr.f32.mxu1 %v350_v48  ;;  %v353_v55 = vmax.f32 %v263_v50, 0.0 }
 0x106   :  { %v974_v53 = vpop.f32.mrf.mxu0  ;;  %1047 = vmatmul.mubr.f32.gmra.mxu1 %v351_v49 }
 0x107   :  { %v352_v54 = vmax.f32 %v258_v52, 0.0  ;;  %v273_v56 = vadd.f32 %v974_v53, %v1298_v0 }
 0x108   :  { %v267_v57 = vpop.f32.mrf.mxu0 }
 0x109   :  { %v268_v58 = vadd.f32 %v1298_v0, %v267_v57  ;;  %1049 = vmatprep.mubr.f32.mxu1 %v352_v54  ;;  %v355_v61 = vmax.f32 %v273_v56, 0.0 }
 0x10a   :  { %v977_v59 = vpop.f32.mrf.mxu0  ;;  %1050 = vmatmul.mubr.f32.gmra.mxu1 %v353_v55 }
 0x10b   :  { %v354_v60 = vmax.f32 %v268_v58, 0.0  ;;  %v283_v62 = vadd.f32 %v977_v59, %v1298_v0 }
 0x10c   :  { %v277_v63 = vpop.f32.mrf.mxu0 }
 0x10d   :  { %v278_v1 = vadd.f32 %v1298_v0, %v277_v63  ;;  %1052 = vmatprep.mubr.f32.mxu1 %v354_v60  ;;  %v357_v4 = vmax.f32 %v283_v62, 0.0 }
 0x10e   :  { %v980_v2 = vpop.f32.mrf.mxu0  ;;  %1053 = vmatmul.mubr.f32.gmra.mxu1 %v355_v61 }
 0x10f   :  { %v356_v3 = vmax.f32 %v278_v1, 0.0  ;;  %v293_v5 = vadd.f32 %v980_v2, %v1298_v0 }
 0x110   :  { %v287_v6 = vpop.f32.mrf.mxu0 }
 0x111   :  { %v288_v7 = vadd.f32 %v1298_v0, %v287_v6  ;;  %1055 = vmatprep.mubr.f32.mxu1 %v356_v3  ;;  %v359_v10 = vmax.f32 %v293_v5, 0.0 }
 0x112   :  { %v983_v8 = vpop.f32.mrf.mxu0  ;;  %1056 = vmatmul.mubr.f32.gmra.mxu1 %v357_v4 }
 0x113   :  { %v358_v9 = vmax.f32 %v288_v7, 0.0  ;;  %v303_v11 = vadd.f32 %v983_v8, %v1298_v0 }
 0x114   :  { %v297_v12 = vpop.f32.mrf.mxu0 }
 0x115   :  { %v298_v13 = vadd.f32 %v1298_v0, %v297_v12  ;;  %1058 = vmatprep.mubr.f32.mxu1 %v358_v9  ;;  %v361_v16 = vmax.f32 %v303_v11, 0.0 }
 0x116   :  { %v986_v14 = vpop.f32.mrf.mxu0  ;;  %1059 = vmatmul.mubr.f32.gmra.mxu1 %v359_v10 }
 0x117   :  { %v360_v15 = vmax.f32 %v298_v13, 0.0  ;;  %v313_v17 = vadd.f32 %v986_v14, %v1298_v0 }
 0x118   :  { %v307_v18 = vpop.f32.mrf.mxu0 }
 0x119   :  { %v308_v19 = vadd.f32 %v1298_v0, %v307_v18  ;;  %1061 = vmatprep.mubr.f32.mxu1 %v360_v15  ;;  %v363_v22 = vmax.f32 %v313_v17, 0.0 }
 0x11a   :  { %v989_v20 = vpop.f32.mrf.mxu0  ;;  %1062 = vmatmul.mubr.f32.gmra.mxu1 %v361_v16 }
 0x11b   :  { %v362_v21 = vmax.f32 %v308_v19, 0.0  ;;  %v323_v23 = vadd.f32 %v989_v20, %v1298_v0 }
 0x11c   :  { %v317_v24 = vpop.f32.mrf.mxu0 }
 0x11d   :  { %v318_v25 = vadd.f32 %v1298_v0, %v317_v24  ;;  %1064 = vmatprep.mubr.f32.mxu1 %v362_v21  ;;  %v365_v28 = vmax.f32 %v323_v23, 0.0 }
 0x11e   :  { %v992_v26 = vpop.f32.mrf.mxu0  ;;  %1065 = vmatmul.mubr.f32.gmra.mxu1 %v363_v22 }
 0x11f   :  { %v364_v27 = vmax.f32 %v318_v25, 0.0  ;;  %v333_v29 = vadd.f32 %v992_v26, %v1298_v0 }
 0x120   :  { %v327_v30 = vpop.f32.mrf.mxu0 }
 0x121   :  { %v328_v31 = vadd.f32 %v1298_v0, %v327_v30  ;;  %1067 = vmatprep.mubr.f32.mxu1 %v364_v27  ;;  %v367_v33 = vmax.f32 %v333_v29, 0.0 }
 0x122   :  { %1068 = vmatmul.mubr.f32.gmra.mxu1 %v365_v28 }
 0x123   :  { %v366_v32 = vmax.f32 %v328_v31, 0.0 }
 0x125   :  { %1070 = vmatprep.mubr.f32.mxu1 %v366_v32 }
 0x126   :  { %1071 = vmatmul.mubr.f32.gmra.mxu1 %v367_v33 }
 0x1aa   :  { %v1027_v35 = vpop.f32.mrf.mxu1 }
 0x1ab   :  { %v748_v36 = vadd.f32 %v1027_v35, %v1335_v34 }
 0x1ac   :  { %v482_v37 = vpop.f32.mrf.mxu1 }
 0x1ad   :  { %780 = vst [vmem:[%s1470_s5 + $0x8] sm:$0xff] %v748_v36  ;;  %v747_v0 = vadd.f32 %v1335_v34, %v482_v37 }
 0x1ae   :  { %v1030_v38 = vpop.f32.mrf.mxu1 }
 0x1af   :  { %779 = vst [vmem:[%s1470_s5] sm:$0xff] %v747_v0  ;;  %v750_v39 = vadd.f32 %v1030_v38, %v1335_v34 }
 0x1b0   :  { %v492_v40 = vpop.f32.mrf.mxu1 }
 0x1b1   :  { %782 = vst [vmem:[%s1470_s5 + $0x18] sm:$0xff] %v750_v39  ;;  %v749_v41 = vadd.f32 %v1335_v34, %v492_v40 }
 0x1b2   :  { %v1033_v42 = vpop.f32.mrf.mxu1 }
 0x1b3   :  { %781 = vst [vmem:[%s1470_s5 + $0x10] sm:$0xff] %v749_v41  ;;  %v752_v43 = vadd.f32 %v1033_v42, %v1335_v34 }
 0x1b4   :  { %v502_v44 = vpop.f32.mrf.mxu1 }
 0x1b5   :  { %784 = vst [vmem:[%s1470_s5 + $0x28] sm:$0xff] %v752_v43  ;;  %v751_v45 = vadd.f32 %v1335_v34, %v502_v44 }
 0x1b6   :  { %v1036_v46 = vpop.f32.mrf.mxu1 }
 0x1b7   :  { %783 = vst [vmem:[%s1470_s5 + $0x20] sm:$0xff] %v751_v45  ;;  %v754_v47 = vadd.f32 %v1036_v46, %v1335_v34 }
 0x1b8   :  { %v512_v48 = vpop.f32.mrf.mxu1 }
 0x1b9   :  { %786 = vst [vmem:[%s1470_s5 + $0x38] sm:$0xff] %v754_v47  ;;  %v753_v49 = vadd.f32 %v1335_v34, %v512_v48 }
 0x1ba   :  { %v1039_v50 = vpop.f32.mrf.mxu1 }
 0x1bb   :  { %785 = vst [vmem:[%s1470_s5 + $0x30] sm:$0xff] %v753_v49  ;;  %v756_v51 = vadd.f32 %v1039_v50, %v1335_v34 }
 0x1bc   :  { %v522_v52 = vpop.f32.mrf.mxu1 }
 0x1bd   :  { %788 = vst [vmem:[%s1470_s5 + $0x48] sm:$0xff] %v756_v51  ;;  %v755_v53 = vadd.f32 %v1335_v34, %v522_v52 }
 0x1be   :  { %v1042_v54 = vpop.f32.mrf.mxu1 }
 0x1bf   :  { %787 = vst [vmem:[%s1470_s5 + $0x40] sm:$0xff] %v755_v53  ;;  %v758_v55 = vadd.f32 %v1042_v54, %v1335_v34 }
 0x1c0   :  { %v532_v56 = vpop.f32.mrf.mxu1 }
 0x1c1   :  { %790 = vst [vmem:[%s1470_s5 + $0x58] sm:$0xff] %v758_v55  ;;  %v757_v57 = vadd.f32 %v1335_v34, %v532_v56 }
 0x1c2   :  { %v1045_v58 = vpop.f32.mrf.mxu1 }
 0x1c3   :  { %789 = vst [vmem:[%s1470_s5 + $0x50] sm:$0xff] %v757_v57  ;;  %v760_v59 = vadd.f32 %v1045_v58, %v1335_v34 }
 0x1c4   :  { %v542_v60 = vpop.f32.mrf.mxu1 }
 0x1c5   :  { %792 = vst [vmem:[%s1470_s5 + $0x68] sm:$0xff] %v760_v59  ;;  %v759_v61 = vadd.f32 %v1335_v34, %v542_v60 }
 0x1c6   :  { %v1048_v62 = vpop.f32.mrf.mxu1 }
 0x1c7   :  { %791 = vst [vmem:[%s1470_s5 + $0x60] sm:$0xff] %v759_v61  ;;  %v762_v63 = vadd.f32 %v1048_v62, %v1335_v34 }
 0x1c8   :  { %v552_v1 = vpop.f32.mrf.mxu1 }
 0x1c9   :  { %794 = vst [vmem:[%s1470_s5 + $0x78] sm:$0xff] %v762_v63  ;;  %v761_v2 = vadd.f32 %v1335_v34, %v552_v1 }
 0x1ca   :  { %v1051_v3 = vpop.f32.mrf.mxu1 }
 0x1cb   :  { %793 = vst [vmem:[%s1470_s5 + $0x70] sm:$0xff] %v761_v2  ;;  %v764_v4 = vadd.f32 %v1051_v3, %v1335_v34 }
 0x1cc   :  { %v562_v5 = vpop.f32.mrf.mxu1 }
 0x1cd   :  { %796 = vst [vmem:[%s1470_s5 + $0x88] sm:$0xff] %v764_v4  ;;  %v763_v6 = vadd.f32 %v1335_v34, %v562_v5 }
 0x1ce   :  { %v1054_v7 = vpop.f32.mrf.mxu1 }
 0x1cf   :  { %795 = vst [vmem:[%s1470_s5 + $0x80] sm:$0xff] %v763_v6  ;;  %v766_v8 = vadd.f32 %v1054_v7, %v1335_v34 }
 0x1d0   :  { %v572_v9 = vpop.f32.mrf.mxu1 }
 0x1d1   :  { %798 = vst [vmem:[%s1470_s5 + $0x98] sm:$0xff] %v766_v8  ;;  %v765_v10 = vadd.f32 %v1335_v34, %v572_v9 }
 0x1d2   :  { %v1057_v11 = vpop.f32.mrf.mxu1 }
 0x1d3   :  { %797 = vst [vmem:[%s1470_s5 + $0x90] sm:$0xff] %v765_v10  ;;  %v768_v12 = vadd.f32 %v1057_v11, %v1335_v34 }
 0x1d4   :  { %v582_v13 = vpop.f32.mrf.mxu1 }
 0x1d5   :  { %800 = vst [vmem:[%s1470_s5 + $0xa8] sm:$0xff] %v768_v12  ;;  %v767_v14 = vadd.f32 %v1335_v34, %v582_v13 }
 0x1d6   :  { %v1060_v15 = vpop.f32.mrf.mxu1 }
 0x1d7   :  { %799 = vst [vmem:[%s1470_s5 + $0xa0] sm:$0xff] %v767_v14  ;;  %v770_v16 = vadd.f32 %v1060_v15, %v1335_v34 }
 0x1d8   :  { %v592_v17 = vpop.f32.mrf.mxu1 }
 0x1d9   :  { %802 = vst [vmem:[%s1470_s5 + $0xb8] sm:$0xff] %v770_v16  ;;  %v769_v18 = vadd.f32 %v1335_v34, %v592_v17 }
 0x1da   :  { %v1063_v19 = vpop.f32.mrf.mxu1 }
 0x1db   :  { %801 = vst [vmem:[%s1470_s5 + $0xb0] sm:$0xff] %v769_v18  ;;  %v772_v20 = vadd.f32 %v1063_v19, %v1335_v34 }
 0x1dc   :  { %v602_v21 = vpop.f32.mrf.mxu1 }
 0x1dd   :  { %804 = vst [vmem:[%s1470_s5 + $0xc8] sm:$0xff] %v772_v20  ;;  %v771_v22 = vadd.f32 %v1335_v34, %v602_v21 }
 0x1de   :  { %v1066_v23 = vpop.f32.mrf.mxu1 }
 0x1df   :  { %803 = vst [vmem:[%s1470_s5 + $0xc0] sm:$0xff] %v771_v22  ;;  %v774_v24 = vadd.f32 %v1066_v23, %v1335_v34 }
 0x1e0   :  { %v612_v25 = vpop.f32.mrf.mxu1 }
 0x1e1   :  { %806 = vst [vmem:[%s1470_s5 + $0xd8] sm:$0xff] %v774_v24  ;;  %v773_v26 = vadd.f32 %v1335_v34, %v612_v25 }
 0x1e2   :  { %v1069_v27 = vpop.f32.mrf.mxu1 }
 0x1e3   :  { %805 = vst [vmem:[%s1470_s5 + $0xd0] sm:$0xff] %v773_v26  ;;  %v776_v28 = vadd.f32 %v1069_v27, %v1335_v34 }
 0x1e4   :  { %v622_v29 = vpop.f32.mrf.mxu1 }
 0x1e5   :  { %808 = vst [vmem:[%s1470_s5 + $0xe8] sm:$0xff] %v776_v28  ;;  %v775_v30 = vadd.f32 %v1335_v34, %v622_v29 }
 0x1e6   :  { %v1072_v31 = vpop.f32.mrf.mxu1 }
 0x1e7   :  { %807 = vst [vmem:[%s1470_s5 + $0xe0] sm:$0xff] %v775_v30  ;;  %v778_v32 = vadd.f32 %v1072_v31, %v1335_v34 }
 0x1e8   :  { %v632_v33 = vpop.f32.mrf.mxu1 }
 0x1e9   :  { %810 = vst [vmem:[%s1470_s5 + $0xf8] sm:$0xff] %v778_v32  ;;  %v777_v35 = vadd.f32 %v1335_v34, %v632_v33 }
 0x1eb   :  { %809 = vst [vmem:[%s1470_s5 + $0xf0] sm:$0xff] %v777_v35 }

</bundles_post_ra>
